<compile_context>
chip_gen: v7x
topology: tpu7x:2x2x1
jax: 0.10.0
libtpu: 0.0.40
codegen_flags: <defaults>
</compile_context>

<pallas_src>
import math
from functools import partial

import jax
import jax.numpy as jnp
import numpy as np
from jax.experimental import pallas as pl
from jax.experimental.pallas import tpu as pltpu


# -----------------------------------------------------------------------------
# VGG19 "features" layer configuration (torchvision ordering).
# -----------------------------------------------------------------------------
def vgg19_layer_config():
    cfg = [64, 64, 'M', 128, 128, 'M', 256, 256, 256, 256, 'M',
           512, 512, 512, 512, 'M', 512, 512, 512, 512, 'M']
    layers = []
    cin = 3
    for v in cfg:
        if v == 'M':
            layers.append(('pool',))
        else:
            layers.append(('conv', cin, v))
            layers.append(('relu',))
            cin = v
    return layers


LAYERS = vgg19_layer_config()


# -----------------------------------------------------------------------------
# VMEM capacity query (generation-aware budgeting: 128 MiB v5e/v6e, 64 MiB v7x)
# -----------------------------------------------------------------------------
_VMEM_CAP = None


def _vmem_capacity():
    global _VMEM_CAP
    if _VMEM_CAP is None:
        try:
            _VMEM_CAP = int(pltpu.get_tpu_info().vmem_capacity_bytes)
        except Exception:
            _VMEM_CAP = 64 * 1024 * 1024
    return _VMEM_CAP


def _conv_vmem_limit(slab_rows, k, ntaps, rows, tco, itemsize):
    lane, sub = 128, (8 if itemsize >= 4 else 16)
    pad = lambda a, m: ((a + m - 1) // m) * m
    slab_b = pad(slab_rows, sub) * pad(k, lane) * itemsize
    w_b = ntaps * pad(k, sub) * pad(tco, lane) * itemsize
    o_b = pad(rows, sub) * pad(tco, lane) * itemsize
    acc_b = pad(rows, 8) * pad(tco, lane) * 4          # f32 accumulator temporaries
    est = 2 * (slab_b + w_b + o_b + 8 * pad(tco, lane)) + 3 * acc_b + (1 << 20)
    cap = max(_vmem_capacity(), 32 * 1024 * 1024)
    return int(min(max(est, 16 * 1024 * 1024), (3 * cap) // 4))


# -----------------------------------------------------------------------------
# Pallas kernels
# -----------------------------------------------------------------------------
def _conv3x3_bias_act_kernel(x_ref, w_ref, b_ref, o_ref, *, offsets, apply_relu):
    """Fused 3x3 conv (+ bias + optional ReLU) as `len(offsets)` window matmuls.

    x_ref : (1, SLAB_ROWS, K)      padded activation slab, VMEM-resident across
                                   cout/row tiles (index map constant in co, r)
    w_ref : (NTAPS, K, TCO)        one (K, TCO) matrix per tap
    b_ref : (1, TCO)               float32 bias
    o_ref : (1, ROWS, TCO)         output tile; for the 9-tap path ROWS = TH*(W+2)
                                   and the 2 junk columns/row are discarded later
    """
    rows = o_ref.shape[1]
    tco = o_ref.shape[2]
    r = pl.program_id(2)
    base = r * rows
    aligned = (rows % 8 == 0) and all(o % 8 == 0 for o in offsets)

    # Accumulator initialized from the broadcast bias (saves one full f32 VPU add).
    acc = jnp.broadcast_to(b_ref[...], (rows, tco)).astype(jnp.float32)
    for t, off in enumerate(offsets):
        start = base + off
        if aligned:
            start = pl.multiple_of(start, 8)
        a = x_ref[0, pl.ds(start, rows), :]            # (ROWS, K) window
        acc = acc + jnp.dot(a, w_ref[t], preferred_element_type=jnp.float32)
    if apply_relu:
        acc = jnp.maximum(acc, 0.0)                    # free VPU epilogue
    o_ref[0] = acc.astype(o_ref.dtype)


def _maxpool2x2_kernel(x_ref, o_ref):
    """2x2 stride-2 max pool.

    x_ref : (1, TH2, 2, W2, 2*C)  width-pair folded into lanes (free wrapper reshape)
    o_ref : (1, TH2, W2, C)
    """
    c = o_ref.shape[-1]
    m = jnp.maximum(x_ref[0, :, 0, :, :], x_ref[0, :, 1, :, :])   # row-pair max
    o_ref[0] = jnp.maximum(m[:, :, :c], m[:, :, c:])              # column-pair max


# -----------------------------------------------------------------------------
# Wrappers
# -----------------------------------------------------------------------------
def _fold_normalization(w, b, mean, std):
    """Fold (x+1)/2 -> (x-mean)/std (i.e. x*s + t) into conv1_1 weights/bias.

    Returns folded (w, b) plus the per-channel raw-input pad value whose
    normalized image is exactly 0 (keeps SAME-padding equivalence).
    """
    s = 0.5 / std
    t = (0.5 - mean) / std
    w_f = w * s.reshape(1, 1, -1, 1)
    b_f = b + jnp.einsum('hwio,i->o', w, t)
    pad_value = 2.0 * mean - 1.0
    return w_f, b_f, pad_value


def conv3x3_bias_act(x_nhwc, w_hwio, b, *, apply_relu, pad_value=None,
                     compute_dtype=jnp.bfloat16):
    """3x3 conv (stride 1, SAME) + bias + optional ReLU, fused in one pallas_call."""
    n, h, wd, cin = x_nhwc.shape
    cout = w_hwio.shape[-1]
    itemsize = jnp.dtype(compute_dtype).itemsize

    small_cin = cin < 8          # conv1_1: 3-channel input
    pad_rows = (1, 1) if small_cin else (1, 2)   # extra bottom row keeps 9-tap windows in-bounds

    # Spatial padding (zeros, or the folded-normalization per-channel value).
    if pad_value is not None:
        pv = pad_value.reshape(1, 1, 1, cin).astype(jnp.float32)
        xp = jnp.pad(x_nhwc.astype(jnp.float32) - pv,
                     ((0, 0), pad_rows, (1, 1), (0, 0))) + pv
        xp = xp.astype(compute_dtype)
    else:
        xp = jnp.pad(x_nhwc.astype(compute_dtype),
                     ((0, 0), pad_rows, (1, 1), (0, 0)))

    if small_cin:
        # conv1_1 special case: fold all 9 taps in the wrapper (K = 9*Cin = 27).
        # Tiny (27 channels vs. the layer's 64-channel output); avoids K=3 MXU
        # contractions and a 42x lane-padded resident slab.
        k = 9 * cin
        taps = [xp[:, dy:dy + h, dx:dx + wd, :] for dy in range(3) for dx in range(3)]
        slab = jnp.concatenate(taps, axis=-1).reshape(n, h * wd, k)
        w2 = w_hwio.astype(jnp.float32).reshape(1, k, cout).astype(compute_dtype)
        offsets = (0,)
        wp = wd                                    # output rows carry no junk columns
    else:
        # Generic path: single padded slab, 9 in-kernel window matmuls with K = Cin.
        k = cin
        wp = wd + 2
        slab = xp.reshape(n, (h + 3) * wp, k)
        w2 = w_hwio.astype(jnp.float32).reshape(9, k, cout).astype(compute_dtype)
        offsets = tuple(dy * wp + dx for dy in range(3) for dx in range(3))

    b2 = b.astype(jnp.float32).reshape(1, cout)
    slab_rows = slab.shape[1]

    # Tiling: lane-dense Cout tiles where the layer allows; row tiles bound block size.
    tco = cout if cout <= 256 else 256
    co_tiles = cout // tco
    th = h
    while th * wp > 4096 and th % 2 == 0 and ((th // 2) * wp) % 8 == 0:
        th //= 2
    rows = th * wp
    r_tiles = h // th

    vmem_limit = _conv_vmem_limit(slab_rows, k, len(offsets), rows, tco, itemsize)

    kernel = partial(_conv3x3_bias_act_kernel, offsets=offsets, apply_relu=apply_relu)
    out = pl.pallas_call(
        kernel,
        out_shape=jax.ShapeDtypeStruct((n, r_tiles * rows, cout), compute_dtype),
        grid=(n, co_tiles, r_tiles),
        in_specs=[
            # Padded slab: resident across Cout/row tiles (index map ignores co, r).
            pl.BlockSpec((1, slab_rows, k), lambda ni, co, r: (ni, 0, 0)),
            # Weights / bias resident across row tiles.
            pl.BlockSpec((len(offsets), k, tco), lambda ni, co, r: (0, 0, co)),
            pl.BlockSpec((1, tco), lambda ni, co, r: (0, co)),
        ],
        out_specs=pl.BlockSpec((1, rows, tco), lambda ni, co, r: (ni, r, co)),
        compiler_params=pltpu.CompilerParams(
            # Batch-only megacore sharding: avoids both v7x cores re-DMAing the slab.
            dimension_semantics=("parallel", "arbitrary", "arbitrary"),
            vmem_limit_bytes=vmem_limit),
        cost_estimate=pl.CostEstimate(
            flops=2 * n * h * wd * 9 * cin * cout,
            transcendentals=0,
            bytes_accessed=int(slab.size * itemsize + w2.size * itemsize
                               + n * h * wp * cout * itemsize)),
    )(slab, w2, b2)

    out = out.reshape(n, h, wp, cout)
    if wp != wd:
        out = out[:, :, :wd, :]      # drop junk columns (fuses into the next layer's pad)
    return out


def maxpool2x2(x_nhwc, *, compute_dtype=jnp.bfloat16):
    """2x2 stride-2 max pool (floors odd dims, like torch)."""
    n, h, wd, c = x_nhwc.shape
    h2, w2 = h // 2, wd // 2
    xc = x_nhwc[:, :h2 * 2, :w2 * 2, :].astype(compute_dtype)
    # Free reshape: row pairs -> separate axis, width pairs -> folded into lanes.
    x5 = xc.reshape(n, h2, 2, w2, 2 * c)

    itemsize = jnp.dtype(compute_dtype).itemsize
    th2 = h2
    while th2 * 2 * w2 * 2 * c * itemsize > 4 * 1024 * 1024 and th2 % 2 == 0:
        th2 //= 2
    r_tiles = h2 // th2

    return pl.pallas_call(
        _maxpool2x2_kernel,
        out_shape=jax.ShapeDtypeStruct((n, h2, w2, c), compute_dtype),
        grid=(n, r_tiles),
        in_specs=[pl.BlockSpec((1, th2, 2, w2, 2 * c),
                               lambda ni, r: (ni, r, 0, 0, 0))],
        out_specs=pl.BlockSpec((1, th2, w2, c), lambda ni, r: (ni, r, 0, 0)),
        compiler_params=pltpu.CompilerParams(
            dimension_semantics=("parallel", "parallel")),
    )(x5)


# -----------------------------------------------------------------------------
# PerceptualVGG19 forward (Pallas version)
# -----------------------------------------------------------------------------
def _flatten_like_torch(x_nhwc):
    # Torch flattens NCHW; keep the copy in the compute dtype (single f32 cast later).
    n = x_nhwc.shape[0]
    return jnp.transpose(x_nhwc, (0, 3, 1, 2)).reshape(n, -1)


def perceptual_vgg19_forward(x_nchw, params, mean, std, feature_layers,
                             use_normalization=True,
                             compute_dtype=jnp.bfloat16):
    feature_layers = sorted(feature_layers)
    max_layer = max(feature_layers)
    cur = jnp.transpose(x_nchw, (0, 2, 3, 1)).astype(jnp.float32)   # NCHW -> NHWC

    feats = []
    i = 0
    while i <= max_layer:
        kind = LAYERS[i][0]
        if kind == 'conv':
            w, b = params[i]
            pad_value = None
            if i == 0 and use_normalization:
                w, b, pad_value = _fold_normalization(w, b, mean, std)
            fuse_relu = (i + 1 <= max_layer and LAYERS[i + 1][0] == 'relu'
                         and i not in feature_layers)
            cur = conv3x3_bias_act(cur, w, b, apply_relu=fuse_relu,
                                   pad_value=pad_value,
                                   compute_dtype=compute_dtype)
            if i in feature_layers:
                feats.append(_flatten_like_torch(cur))
            i += 1
            if fuse_relu:
                if i in feature_layers:           # the fused ReLU layer's output
                    feats.append(_flatten_like_torch(cur))
                i += 1
        elif kind == 'relu':
            # Only reached when the preceding conv's output was itself a feature.
            # TODO(synk): rare unfused-ReLU path kept as a plain XLA elementwise op.
            cur = jnp.maximum(cur, 0).astype(compute_dtype)
            if i in feature_layers:
                feats.append(_flatten_like_torch(cur))
            i += 1
        else:  # pool (cannot be fused upstream: its input relu1_2 is a requested feature)
            cur = maxpool2x2(cur, compute_dtype=compute_dtype)
            if i in feature_layers:
                feats.append(_flatten_like_torch(cur))
            i += 1

    return None, jnp.concatenate(feats, axis=1).astype(jnp.float32)


# -----------------------------------------------------------------------------
# Pure-JAX reference (exact torch semantics, f32, unfolded normalization)
# -----------------------------------------------------------------------------
def reference_forward(x_nchw, params, mean, std, feature_layers,
                      use_normalization=True):
    feature_layers = sorted(feature_layers)
    x = x_nchw.astype(jnp.float32)
    if use_normalization:
        x = (x + 1.0) / 2.0
        x = (x - mean.reshape(1, 3, 1, 1)) / std.reshape(1, 3, 1, 1)
    cur = jnp.transpose(x, (0, 2, 3, 1))
    feats = []
    for i in range(max(feature_layers) + 1):
        kind = LAYERS[i][0]
        if kind == 'conv':
            w, b = params[i]
            cur = jax.lax.conv_general_dilated(
                cur, w, (1, 1), 'SAME',
                dimension_numbers=('NHWC', 'HWIO', 'NHWC')) + b
        elif kind == 'relu':
            cur = jnp.maximum(cur, 0.0)
        else:
            cur = jax.lax.reduce_window(cur, -jnp.inf, jax.lax.max,
                                        (1, 2, 2, 1), (1, 2, 2, 1), 'VALID')
        if i in feature_layers:
            feats.append(jnp.transpose(cur, (0, 3, 1, 2)).reshape(cur.shape[0], -1))
    return None, jnp.concatenate(feats, axis=1)


# -----------------------------------------------------------------------------
# Deterministic parameter construction
# -----------------------------------------------------------------------------
def init_params(max_layer, key):
    params = {}
    for i, layer in enumerate(LAYERS[:max_layer + 1]):
        if layer[0] == 'conv':
            cin, cout = layer[1], layer[2]
            key, kw, kb = jax.random.split(key, 3)
            scale = 1.0 / math.sqrt(9.0 * cin)
            w = jax.random.normal(kw, (3, 3, cin, cout), jnp.float32) * scale
            b = jax.random.normal(kb, (cout,), jnp.float32) * 0.01
            params[i] = (w, b)
    return params


if __name__ == "__main__":
    # feature_layers = [3, 8] -> relu1_2 and relu2_2 of VGG19.
    feature_layers = [3, 8]
    use_normalization = True

    key = jax.random.PRNGKey(0)
    key, kx = jax.random.split(key)
    x = jax.random.uniform(kx, (2, 3, 16, 16), jnp.float32, minval=-1.0, maxval=1.0)

    mean = jnp.array([0.485, 0.456, 0.406], jnp.float32)
    std = jnp.array([0.229, 0.224, 0.225], jnp.float32)
    params = init_params(max(feature_layers), key)

    _, feats_ref = reference_forward(x, params, mean, std, feature_layers,
                                     use_normalization)
    feats_ref = jax.block_until_ready(feats_ref)

    # float32 compute path (exercises the same kernels with f32 tiles).
    _, feats_f32 = perceptual_vgg19_forward(x, params, mean, std, feature_layers,
                                            use_normalization,
                                            compute_dtype=jnp.float32)
    feats_f32 = jax.block_until_ready(feats_f32)

    # bfloat16 compute path (shipped config): bf16 MXU inputs, f32 accumulation,
    # bf16 intermediate activations.
    _, feats_bf16 = perceptual_vgg19_forward(x, params, mean, std, feature_layers,
                                             use_normalization,
                                             compute_dtype=jnp.bfloat16)
    feats_bf16 = jax.block_until_ready(feats_bf16)

    expected_dim = 64 * 16 * 16 + 128 * 8 * 8   # relu1_2 + relu2_2 flattened
    assert feats_f32.shape == (2, expected_dim), feats_f32.shape
    assert feats_bf16.shape == (2, expected_dim), feats_bf16.shape

    # Tolerances account for bf16 MXU input rounding (TPU default matmul precision)
    # and the re-associated normalization folding; activations are O(1).
    np.testing.assert_allclose(np.asarray(feats_f32), np.asarray(feats_ref),
                               rtol=5e-2, atol=5e-2)
    np.testing.assert_allclose(np.asarray(feats_bf16), np.asarray(feats_ref),
                               rtol=5e-2, atol=5e-2)

    print("KERNEL_OK")
</pallas_src>

<mosaic_0001>
module attributes {stable_mosaic.version = 11 : i64} {
  func.func @_conv3x3_bias_act_kernel(%arg0: i32, %arg1: i32, %arg2: i32, %arg3: memref<1x256x27xf32, #tpu.memory_space<vmem>>, %arg4: memref<1x27x64xf32, #tpu.memory_space<vmem>>, %arg5: memref<1x64xf32, #tpu.memory_space<vmem>>, %arg6: memref<1x256x64xf32, #tpu.memory_space<vmem>>) attributes {dimension_semantics = [#tpu.dimension_semantics<parallel>, #tpu.dimension_semantics<arbitrary>, #tpu.dimension_semantics<arbitrary>], iteration_bounds = array<i64: 2, 1, 1>, scalar_prefetch = 0 : i64, scratch_operands = 0 : i64, tpu.core_type = #tpu.core_type<tc>, window_params = [{transform_indices = @transform_0, window_bounds = array<i64: 1, 256, 27>}, {transform_indices = @transform_1, window_bounds = array<i64: 1, 27, 64>}, {transform_indices = @transform_2, window_bounds = array<i64: 1, 64>}, {transform_indices = @transform_3, window_bounds = array<i64: 1, 256, 64>}]} {
    %c256_i32 = arith.constant 256 : i32
    %0 = arith.muli %arg2, %c256_i32 : i32
    %c0 = arith.constant 0 : index
    %c0_0 = arith.constant 0 : index
    %1 = vector.load %arg5[%c0, %c0_0] : memref<1x64xf32, #tpu.memory_space<vmem>>, vector<1x64xf32>
    %2 = vector.shape_cast %1 : vector<1x64xf32> to vector<1x64xf32>
    %3 = vector.broadcast %2 : vector<1x64xf32> to vector<256x64xf32>
    %c0_i32 = arith.constant 0 : i32
    %4 = arith.addi %0, %c0_i32 : i32
    %5 = tpu.assume_multiple %4, 8 : i32
    %c0_1 = arith.constant 0 : index
    %6 = arith.index_cast %5 : i32 to index
    %c0_2 = arith.constant 0 : index
    %7 = vector.load %arg3[%c0_1, %6, %c0_2] : memref<1x256x27xf32, #tpu.memory_space<vmem>>, vector<1x256x27xf32>
    %8 = vector.shape_cast %7 : vector<1x256x27xf32> to vector<256x27xf32>
    %c0_3 = arith.constant 0 : index
    %c0_4 = arith.constant 0 : index
    %c0_5 = arith.constant 0 : index
    %9 = vector.load %arg4[%c0_3, %c0_4, %c0_5] : memref<1x27x64xf32, #tpu.memory_space<vmem>>, vector<1x27x64xf32>
    %10 = vector.shape_cast %9 : vector<1x27x64xf32> to vector<27x64xf32>
    %cst = arith.constant dense<0.000000e+00> : vector<256x64xf32>
    %11 = tpu.matmul %8, %10, %cst {dimension_numbers = #tpu.dot_dimension_numbers<[1], [0], [0], [1], [0, 0, 1, 1], [], []>} : vector<256x27xf32>, vector<27x64xf32>, vector<256x64xf32> -> vector<256x64xf32>
    %12 = arith.addf %3, %11 : vector<256x64xf32>
    %cst_6 = arith.constant 0.000000e+00 : f32
    %13 = vector.broadcast %cst_6 : f32 to vector<256x64xf32>
    %14 = arith.maximumf %12, %13 : vector<256x64xf32>
    %c0_7 = arith.constant 0 : index
    %c0_8 = arith.constant 0 : index
    %c0_9 = arith.constant 0 : index
    %15 = vector.load %arg6[%c0_7, %c0_8, %c0_9] : memref<1x256x64xf32, #tpu.memory_space<vmem>>, vector<1x256x64xf32>
    %16 = vector.shape_cast %15 : vector<1x256x64xf32> to vector<256x64xf32>
    %17 = vector.shape_cast %14 : vector<256x64xf32> to vector<1x256x64xf32>
    tpu.vector_store %arg6[%c0_7, %c0_8, %c0_9], %17 {strides = array<i32>} : memref<1x256x64xf32, #tpu.memory_space<vmem>>, vector<1x256x64xf32>,
    return
  }
  func.func @transform_0(%arg0: i32, %arg1: i32, %arg2: i32) -> (i32, i32, i32) {
    %c0_i32 = arith.constant 0 : i32
    %c0_i32_0 = arith.constant 0 : i32
    %c0_i32_1 = arith.constant 0 : i32
    return %arg0, %c0_i32, %c0_i32_0 : i32, i32, i32
  }
  func.func @transform_1(%arg0: i32, %arg1: i32, %arg2: i32) -> (i32, i32, i32) {
    %c0_i32 = arith.constant 0 : i32
    %c0_i32_0 = arith.constant 0 : i32
    %c0_i32_1 = arith.constant 0 : i32
    return %c0_i32, %c0_i32_0, %arg1 : i32, i32, i32
  }
  func.func @transform_2(%arg0: i32, %arg1: i32, %arg2: i32) -> (i32, i32) {
    %c0_i32 = arith.constant 0 : i32
    %c0_i32_0 = arith.constant 0 : i32
    return %c0_i32, %arg1 : i32, i32
  }
  func.func @transform_3(%arg0: i32, %arg1: i32, %arg2: i32) -> (i32, i32, i32) {
    %c0_i32 = arith.constant 0 : i32
    return %arg0, %arg2, %arg1 : i32, i32, i32
  }
}

</mosaic_0001>

<bundles_post_ra>
// kernel: tpu_custom_call.1
= control target key start
LH: loop header
LB: loop body
LE: loop exit
PB: predicated region body
PF: predicated region fallthrough
CT: control target
= control target key end

     0   :  { %s1056_s12 = smov 0   ;;  %s1058_s13 = smov 0   ;;  %s1289_s0 = inlined_call_operand.vmem [shape: f32[2,256,27], index: 0, kind: input, shape index: {}]   ;;  %s1290_s1 = inlined_call_operand.vmem [shape: f32[1,27,64], index: 1, kind: input, shape index: {}]   ;;  %s1291_s2 = inlined_call_operand.vmem [shape: f32[1,64], index: 2, kind: input, shape index: {}]   ;;  %s1292_s3 = inlined_call_operand.vmem [shape: f32[2,256,64], index: 3, kind: output, shape index: {}]  }
   0x1   :  { %s1060_s14 = smov 0  }
   0x2 LB: > { %s32_s15 = sadd.s32 1, %s1029_s13  ;;  %p837_p0 = scmp.ge.s32.totalorder %s1033_s14, 1  ;;  %s1033_s14 = sphi %s1060_s14, %s13_s14   ;;  %s1029_s13 = sphi %s1058_s13, %s1296_s13   ;;  %s1025_s12 = sphi %s1056_s12, %s1295_s12  }
   0x3   : > { %p34_p1 = scmp.ge.s32.totalorder %s32_s15, 2  ;;  %p177_p2 = scmp.lt.s32.totalorder %s1033_s14, 3 }
   0x5   : > { %s1298_s15 = smov (%p34_p1, %s32_s15), 0  ;;  %p178_p3 = pnand %p837_p0, %p177_p2 }
   0x6   : > { %v281_v0 = vld [vmem:[%s1290_s1] sm:$0xff] (!%p178_p3)  ;;  %v282_v1 = vld [vmem:[%s1290_s1 + $0x8] sm:$0xff] (!%p178_p3)  ;;  %v283_v2 = vld [vmem:[%s1290_s1 + $0x10] sm:$0xff] (!%p178_p3)  ;;  %vm382_vm0 = vcmask (!%p178_p3), 1042432   ;;  %p215_p4 = scmp.lt.s32.totalorder (!%p178_p3), %s1025_s12, 1  ;;  %vm1035_vm1 = vmmov (!%p178_p3), 1  }
   0x7   : > { %181 = sbr.rel (%p178_p3) target bundleno = 266 (0x10a), region = 32  ;;  %v972_v3 = vpack.c.bf16 (!%p178_p3), %v282_v1, %v281_v0  ;;  %v284_v4 = vld [vmem:[%s1290_s1 + $0x18] sm:$0x7] (!%p178_p3)  ;;  %vm1086_vm2 = vmpackc.low (!%p178_p3), %vm382_vm0, %vm1035_vm1  ;;  %vm285_vm3 = vcmask (!%p178_p3), 220160   ;;  %v1175_v39 = vld [vmem:[%s1291_s2] ss:$0 sm:$0xff] (!%p178_p3) }
   0x8   : > { %v976_v5 = vpack.c.bf16 (!%p178_p3), %v284_v4, %v283_v2  ;;  %vm675_vm4 = vcmask (!%p178_p3), 523264  }
   0x9   : > { %973 = vmatprep.subr.bf16.mxu0 (!%p178_p3), %v972_v3  ;;  %982 = vmatprep.subr.bf16.mxu1 (!%p178_p3), %v972_v3 }
   0xa   : > { %975 = vmatpush3.bf16.msra.mxu0 (!%p178_p3), %v972_v3  ;;  %984 = vmatpush3.bf16.msra.mxu1 (!%p178_p3), %v972_v3 }
   0xb   : > { %978 = vmatprep.subr.msk.bf16.mxu0 (!%p178_p3), %vm1086_vm2, %v976_v5  ;;  %983 = vmatprep.subr.msk.bf16.mxu1 (!%p178_p3), %vm1086_vm2, %v976_v5 }
   0xe   : > { %s1300_s12 = smov (!%p215_p4, %s1025_s12), 1  ;;  %981 = vmatpush3.bf16.msk.msra.mxu0 %vm1086_vm2, %v976_v5  ;;  %985 = vmatpush3.bf16.msk.msra.mxu1 %vm1086_vm2, %v976_v5 }
   0xf   : > { %s878_s24 = sshll.u32 %s1300_s12, 8 }
  0x10   : > { %s1102_s27 = scalar_lea.vmem %s1289_s0, %s878_s24  ;;  %s1184_s5 = scalar_lea.vmem %s1292_s3, %s878_s24 }
  0x11   : > { %v249_v7 = vld [vmem:[%s1102_s27] sm:$0xff]  ;;  %v250_v9 = vld [vmem:[%s1102_s27 + $0x8] sm:$0xff]  ;;  %v251_v11 = vld [vmem:[%s1102_s27 + $0x10] sm:$0xff] }
  0x12   : > { %v265_v8 = vld [vmem:[%s1102_s27 + $0x80] sm:$0xff]  ;;  %924 = vmatprep.mubr.msk.f32.mxu0 %vm285_vm3, %v249_v7  ;;  %v266_v10 = vld [vmem:[%s1102_s27 + $0x88] sm:$0xff]  ;;  %v267_v12 = vld [vmem:[%s1102_s27 + $0x90] sm:$0xff] }
  0x13   : > { %948 = vmatprep.mubr.msk.f32.mxu1 %vm285_vm3, %v265_v8  ;;  %925 = vmatmul.mubr.msk.f32.vlgmr.msra.gmra.mrb[0].mxu0 %vm285_vm3, %v250_v9  ;;  %v252_v13 = vld [vmem:[%s1102_s27 + $0x18] sm:$0xff]  ;;  %v253_v15 = vld [vmem:[%s1102_s27 + $0x20] sm:$0xff]  ;;  %v254_v17 = vld [vmem:[%s1102_s27 + $0x28] sm:$0xff] }
  0x14   : > { %949 = vmatmul.mubr.msk.f32.vlgmr.msra.gmra.mrb[0].mxu1 %vm285_vm3, %v266_v10  ;;  %927 = vmatprep.mubr.msk.f32.mxu0 %vm285_vm3, %v251_v11  ;;  %v268_v14 = vld [vmem:[%s1102_s27 + $0x98] sm:$0xff]  ;;  %v269_v16 = vld [vmem:[%s1102_s27 + $0xa0] sm:$0xff]  ;;  %v270_v18 = vld [vmem:[%s1102_s27 + $0xa8] sm:$0xff] }
  0x15   : > { %951 = vmatprep.mubr.msk.f32.mxu1 %vm285_vm3, %v267_v12  ;;  %v255_v19 = vld [vmem:[%s1102_s27 + $0x30] sm:$0xff]  ;;  %v256_v21 = vld [vmem:[%s1102_s27 + $0x38] sm:$0xff]  ;;  %v257_v23 = vld [vmem:[%s1102_s27 + $0x40] sm:$0xff] }
  0x16   : > { %v271_v20 = vld [vmem:[%s1102_s27 + $0xb0] sm:$0xff]  ;;  %v272_v22 = vld [vmem:[%s1102_s27 + $0xb8] sm:$0xff]  ;;  %v273_v24 = vld [vmem:[%s1102_s27 + $0xc0] sm:$0xff] }
  0x17   : > { %928 = vmatmul.mubr.msk.f32.gmra.mrb[2].mxu0 %vm285_vm3, %v252_v13  ;;  %v258_v25 = vld [vmem:[%s1102_s27 + $0x48] sm:$0xff]  ;;  %v259_v27 = vld [vmem:[%s1102_s27 + $0x50] sm:$0xff]  ;;  %v260_v29 = vld [vmem:[%s1102_s27 + $0x58] sm:$0xff] }
  0x18   : > { %952 = vmatmul.mubr.msk.f32.gmra.mrb[2].mxu1 %vm285_vm3, %v268_v14  ;;  %930 = vmatprep.mubr.msk.f32.mxu0 %vm285_vm3, %v253_v15  ;;  %v274_v26 = vld [vmem:[%s1102_s27 + $0xc8] sm:$0xff]  ;;  %v275_v28 = vld [vmem:[%s1102_s27 + $0xd0] sm:$0xff]  ;;  %v276_v30 = vld [vmem:[%s1102_s27 + $0xd8] sm:$0xff] }
  0x19   : > { %954 = vmatprep.mubr.msk.f32.mxu1 %vm285_vm3, %v269_v16  ;;  %v261_v31 = vld [vmem:[%s1102_s27 + $0x60] sm:$0xff]  ;;  %v262_v33 = vld [vmem:[%s1102_s27 + $0x68] sm:$0xff]  ;;  %v263_v35 = vld [vmem:[%s1102_s27 + $0x70] sm:$0xff] }
  0x1a   : > { %v277_v32 = vld [vmem:[%s1102_s27 + $0xe0] sm:$0xff]  ;;  %v278_v34 = vld [vmem:[%s1102_s27 + $0xe8] sm:$0xff]  ;;  %v279_v36 = vld [vmem:[%s1102_s27 + $0xf0] sm:$0xff] }
  0x1b   : > { %931 = vmatmul.mubr.msk.f32.gmra.mrb[4].mxu0 %vm285_vm3, %v254_v17  ;;  %v264_v37 = vld [vmem:[%s1102_s27 + $0x78] sm:$0xff] }
  0x1c   : > { %955 = vmatmul.mubr.msk.f32.gmra.mrb[4].mxu1 %vm285_vm3, %v270_v18  ;;  %933 = vmatprep.mubr.msk.f32.mxu0 %vm285_vm3, %v255_v19  ;;  %v280_v38 = vld [vmem:[%s1102_s27 + $0xf8] sm:$0xff] }
  0x1d   : > { %957 = vmatprep.mubr.msk.f32.mxu1 %vm285_vm3, %v271_v20 }
  0x1f   : > { %934 = vmatmul.mubr.msk.f32.gmra.mrb[6].mxu0 %vm285_vm3, %v256_v21 }
  0x20   : > { %958 = vmatmul.mubr.msk.f32.gmra.mrb[6].mxu1 %vm285_vm3, %v272_v22  ;;  %936 = vmatprep.mubr.msk.f32.mxu0 %vm285_vm3, %v257_v23 }
  0x21   : > { %960 = vmatprep.mubr.msk.f32.mxu1 %vm285_vm3, %v273_v24 }
  0x23   : > { %937 = vmatmul.mubr.msk.f32.gmra.mrb[8].mxu0 %vm285_vm3, %v258_v25 }
  0x24   : > { %961 = vmatmul.mubr.msk.f32.gmra.mrb[8].mxu1 %vm285_vm3, %v274_v26  ;;  %939 = vmatprep.mubr.msk.f32.mxu0 %vm285_vm3, %v259_v27 }
  0x25   : > { %963 = vmatprep.mubr.msk.f32.mxu1 %vm285_vm3, %v275_v28 }
  0x27   : > { %940 = vmatmul.mubr.msk.f32.gmra.mrb[10].mxu0 %vm285_vm3, %v260_v29 }
  0x28   : > { %964 = vmatmul.mubr.msk.f32.gmra.mrb[10].mxu1 %vm285_vm3, %v276_v30  ;;  %942 = vmatprep.mubr.msk.f32.mxu0 %vm285_vm3, %v261_v31 }
  0x29   : > { %966 = vmatprep.mubr.msk.f32.mxu1 %vm285_vm3, %v277_v32 }
  0x2b   : > { %943 = vmatmul.mubr.msk.f32.gmra.mrb[12].mxu0 %vm285_vm3, %v262_v33 }
  0x2c   : > { %967 = vmatmul.mubr.msk.f32.gmra.mrb[12].mxu1 %vm285_vm3, %v278_v34  ;;  %945 = vmatprep.mubr.msk.f32.mxu0 %vm285_vm3, %v263_v35 }
  0x2d   : > { %969 = vmatprep.mubr.msk.f32.mxu1 %vm285_vm3, %v279_v36 }
  0x2f   : > { %946 = vmatmul.mubr.msk.f32.gmra.mrb[14].mxu0 %vm285_vm3, %v264_v37 }
  0x30   : > { %970 = vmatmul.mubr.msk.f32.gmra.mrb[14].mxu1 %vm285_vm3, %v280_v38 }
  0xe6   : > { %v926_v40 = vpop.f32.mrb[0].mxu0 }
  0xe7   : > { %v950_v41 = vpop.f32.mrb[0].mxu1  ;;  %v612_v42 = vadd.f32 %v926_v40, %v1175_v39  ;;  %v452_v44 = vpop.f32.mrb[1].mxu0 }
  0xe8   : > { %v628_v43 = vadd.f32 %v950_v41, %v1175_v39  ;;  %v532_v45 = vpop.f32.mrb[1].mxu1  ;;  %v611_v46 = vadd.f32 %v1175_v39, %v452_v44 }
  0xe9   : > { %v627_v47 = vadd.f32 %v1175_v39, %v532_v45  ;;  %v644_v48 = vmax.f32 %v612_v42, 0.0 }
  0xea   : > { %v660_v49 = vmax.f32 %v628_v43, 0.0  ;;  %v643_v50 = vmax.f32 %v611_v46, 0.0  ;;  %v929_v52 = vpop.f32.mrb[2].mxu0 }
  0xeb   : > { %v659_v51 = vmax.f32 %v627_v47, 0.0  ;;  %v953_v53 = vpop.f32.mrb[2].mxu1  ;;  %677 = vst.msk [vmem:[%s1184_s5 + $0x8] sm:$0xff] %vm675_vm4, %v644_v48  ;;  %v614_v54 = vadd.f32 %v929_v52, %v1175_v39  ;;  %v462_v56 = vpop.f32.mrb[3].mxu0 }
  0xec   : > { %693 = vst.msk [vmem:[%s1184_s5 + $0x88] sm:$0xff] %vm675_vm4, %v660_v49  ;;  %v630_v55 = vadd.f32 %v953_v53, %v1175_v39  ;;  %v542_v57 = vpop.f32.mrb[3].mxu1  ;;  %676 = vst.msk [vmem:[%s1184_s5] sm:$0xff] %vm675_vm4, %v643_v50  ;;  %v613_v58 = vadd.f32 %v1175_v39, %v462_v56 }
  0xed   : > { %692 = vst.msk [vmem:[%s1184_s5 + $0x80] sm:$0xff] %vm675_vm4, %v659_v51  ;;  %v629_v59 = vadd.f32 %v1175_v39, %v542_v57  ;;  %v646_v60 = vmax.f32 %v614_v54, 0.0 }
  0xee   : > { %v662_v61 = vmax.f32 %v630_v55, 0.0  ;;  %v645_v62 = vmax.f32 %v613_v58, 0.0  ;;  %v932_v0 = vpop.f32.mrb[4].mxu0 }
  0xef   : > { %v661_v63 = vmax.f32 %v629_v59, 0.0  ;;  %v956_v1 = vpop.f32.mrb[4].mxu1  ;;  %679 = vst.msk [vmem:[%s1184_s5 + $0x18] sm:$0xff] %vm675_vm4, %v646_v60  ;;  %v616_v2 = vadd.f32 %v932_v0, %v1175_v39  ;;  %v472_v4 = vpop.f32.mrb[5].mxu0 }
  0xf0   : > { %695 = vst.msk [vmem:[%s1184_s5 + $0x98] sm:$0xff] %vm675_vm4, %v662_v61  ;;  %v632_v3 = vadd.f32 %v956_v1, %v1175_v39  ;;  %v552_v5 = vpop.f32.mrb[5].mxu1  ;;  %678 = vst.msk [vmem:[%s1184_s5 + $0x10] sm:$0xff] %vm675_vm4, %v645_v62  ;;  %v615_v6 = vadd.f32 %v1175_v39, %v472_v4 }
  0xf1   : > { %694 = vst.msk [vmem:[%s1184_s5 + $0x90] sm:$0xff] %vm675_vm4, %v661_v63  ;;  %v631_v7 = vadd.f32 %v1175_v39, %v552_v5  ;;  %v648_v8 = vmax.f32 %v616_v2, 0.0 }
  0xf2   : > { %v664_v9 = vmax.f32 %v632_v3, 0.0  ;;  %v647_v10 = vmax.f32 %v615_v6, 0.0  ;;  %v935_v12 = vpop.f32.mrb[6].mxu0 }
  0xf3   : > { %v663_v11 = vmax.f32 %v631_v7, 0.0  ;;  %v959_v13 = vpop.f32.mrb[6].mxu1  ;;  %681 = vst.msk [vmem:[%s1184_s5 + $0x28] sm:$0xff] %vm675_vm4, %v648_v8  ;;  %v618_v14 = vadd.f32 %v935_v12, %v1175_v39  ;;  %v482_v16 = vpop.f32.mrb[7].mxu0 }
  0xf4   : > { %697 = vst.msk [vmem:[%s1184_s5 + $0xa8] sm:$0xff] %vm675_vm4, %v664_v9  ;;  %v634_v15 = vadd.f32 %v959_v13, %v1175_v39  ;;  %v562_v17 = vpop.f32.mrb[7].mxu1  ;;  %680 = vst.msk [vmem:[%s1184_s5 + $0x20] sm:$0xff] %vm675_vm4, %v647_v10  ;;  %v617_v18 = vadd.f32 %v1175_v39, %v482_v16 }
  0xf5   : > { %696 = vst.msk [vmem:[%s1184_s5 + $0xa0] sm:$0xff] %vm675_vm4, %v663_v11  ;;  %v633_v19 = vadd.f32 %v1175_v39, %v562_v17  ;;  %v650_v20 = vmax.f32 %v618_v14, 0.0 }
  0xf6   : > { %v666_v21 = vmax.f32 %v634_v15, 0.0  ;;  %v649_v22 = vmax.f32 %v617_v18, 0.0  ;;  %v938_v24 = vpop.f32.mrb[8].mxu0 }
  0xf7   : > { %v665_v23 = vmax.f32 %v633_v19, 0.0  ;;  %v962_v25 = vpop.f32.mrb[8].mxu1  ;;  %683 = vst.msk [vmem:[%s1184_s5 + $0x38] sm:$0xff] %vm675_vm4, %v650_v20  ;;  %v620_v26 = vadd.f32 %v938_v24, %v1175_v39  ;;  %v492_v28 = vpop.f32.mrb[9].mxu0 }
  0xf8   : > { %699 = vst.msk [vmem:[%s1184_s5 + $0xb8] sm:$0xff] %vm675_vm4, %v666_v21  ;;  %v636_v27 = vadd.f32 %v962_v25, %v1175_v39  ;;  %v572_v29 = vpop.f32.mrb[9].mxu1  ;;  %682 = vst.msk [vmem:[%s1184_s5 + $0x30] sm:$0xff] %vm675_vm4, %v649_v22  ;;  %v619_v30 = vadd.f32 %v1175_v39, %v492_v28 }
  0xf9   : > { %698 = vst.msk [vmem:[%s1184_s5 + $0xb0] sm:$0xff] %vm675_vm4, %v665_v23  ;;  %v635_v31 = vadd.f32 %v1175_v39, %v572_v29  ;;  %v652_v32 = vmax.f32 %v620_v26, 0.0 }
  0xfa   : > { %v668_v33 = vmax.f32 %v636_v27, 0.0  ;;  %v651_v34 = vmax.f32 %v619_v30, 0.0  ;;  %v941_v36 = vpop.f32.mrb[10].mxu0 }
  0xfb   : > { %v667_v35 = vmax.f32 %v635_v31, 0.0  ;;  %v965_v37 = vpop.f32.mrb[10].mxu1  ;;  %685 = vst.msk [vmem:[%s1184_s5 + $0x48] sm:$0xff] %vm675_vm4, %v652_v32  ;;  %v622_v38 = vadd.f32 %v941_v36, %v1175_v39  ;;  %v502_v41 = vpop.f32.mrb[11].mxu0 }
  0xfc   : > { %701 = vst.msk [vmem:[%s1184_s5 + $0xc8] sm:$0xff] %vm675_vm4, %v668_v33  ;;  %v638_v40 = vadd.f32 %v965_v37, %v1175_v39  ;;  %v582_v42 = vpop.f32.mrb[11].mxu1  ;;  %684 = vst.msk [vmem:[%s1184_s5 + $0x40] sm:$0xff] %vm675_vm4, %v651_v34  ;;  %v621_v43 = vadd.f32 %v1175_v39, %v502_v41 }
  0xfd   : > { %700 = vst.msk [vmem:[%s1184_s5 + $0xc0] sm:$0xff] %vm675_vm4, %v667_v35  ;;  %v637_v44 = vadd.f32 %v1175_v39, %v582_v42  ;;  %v654_v45 = vmax.f32 %v622_v38, 0.0 }
  0xfe   : > { %v670_v46 = vmax.f32 %v638_v40, 0.0  ;;  %v653_v47 = vmax.f32 %v621_v43, 0.0  ;;  %v944_v49 = vpop.f32.mrb[12].mxu0 }
  0xff   : > { %v669_v48 = vmax.f32 %v637_v44, 0.0  ;;  %v968_v50 = vpop.f32.mrb[12].mxu1  ;;  %687 = vst.msk [vmem:[%s1184_s5 + $0x58] sm:$0xff] %vm675_vm4, %v654_v45  ;;  %v624_v51 = vadd.f32 %v944_v49, %v1175_v39  ;;  %v512_v53 = vpop.f32.mrb[13].mxu0 }
 0x100   : > { %703 = vst.msk [vmem:[%s1184_s5 + $0xd8] sm:$0xff] %vm675_vm4, %v670_v46  ;;  %v640_v52 = vadd.f32 %v968_v50, %v1175_v39  ;;  %v592_v54 = vpop.f32.mrb[13].mxu1  ;;  %686 = vst.msk [vmem:[%s1184_s5 + $0x50] sm:$0xff] %vm675_vm4, %v653_v47  ;;  %v623_v55 = vadd.f32 %v1175_v39, %v512_v53 }
 0x101   : > { %702 = vst.msk [vmem:[%s1184_s5 + $0xd0] sm:$0xff] %vm675_vm4, %v669_v48  ;;  %v639_v56 = vadd.f32 %v1175_v39, %v592_v54  ;;  %v656_v57 = vmax.f32 %v624_v51, 0.0 }
 0x102   : > { %v672_v58 = vmax.f32 %v640_v52, 0.0  ;;  %v655_v59 = vmax.f32 %v623_v55, 0.0  ;;  %v947_v61 = vpop.f32.mrb[14].mxu0 }
 0x103   : > { %v671_v60 = vmax.f32 %v639_v56, 0.0  ;;  %v971_v62 = vpop.f32.mrb[14].mxu1  ;;  %689 = vst.msk [vmem:[%s1184_s5 + $0x68] sm:$0xff] %vm675_vm4, %v656_v57  ;;  %v626_v63 = vadd.f32 %v947_v61, %v1175_v39  ;;  %v522_v1 = vpop.f32.mrb[15].mxu0 }
 0x104   : > { %705 = vst.msk [vmem:[%s1184_s5 + $0xe8] sm:$0xff] %vm675_vm4, %v672_v58  ;;  %v642_v0 = vadd.f32 %v971_v62, %v1175_v39  ;;  %v602_v2 = vpop.f32.mrb[15].mxu1  ;;  %688 = vst.msk [vmem:[%s1184_s5 + $0x60] sm:$0xff] %vm675_vm4, %v655_v59  ;;  %v625_v3 = vadd.f32 %v1175_v39, %v522_v1 }
 0x105   : > { %704 = vst.msk [vmem:[%s1184_s5 + $0xe0] sm:$0xff] %vm675_vm4, %v671_v60  ;;  %v641_v4 = vadd.f32 %v1175_v39, %v602_v2  ;;  %v658_v5 = vmax.f32 %v626_v63, 0.0 }
 0x106   : > { %v674_v6 = vmax.f32 %v642_v0, 0.0  ;;  %v657_v7 = vmax.f32 %v625_v3, 0.0 }
 0x107   : > { %v673_v8 = vmax.f32 %v641_v4, 0.0  ;;  %691 = vst.msk [vmem:[%s1184_s5 + $0x78] sm:$0xff] %vm675_vm4, %v658_v5 }
 0x108   : > { %707 = vst.msk [vmem:[%s1184_s5 + $0xf8] sm:$0xff] %vm675_vm4, %v674_v6  ;;  %690 = vst.msk [vmem:[%s1184_s5 + $0x70] sm:$0xff] %vm675_vm4, %v657_v7 }
 0x109   : > { %706 = vst.msk [vmem:[%s1184_s5 + $0xf0] sm:$0xff] %vm675_vm4, %v673_v8 }
 0x10a PF: > { %s13_s14 = sadd.s32 1, %s1033_s14   ;;  %s1295_s12 = smov %s1029_s13 }
 0x10b   : > { %p10_p5 = scmp.ge.s32.totalorder %s13_s14, 4   ;;  %s1296_s13 = smov %s1298_s15 }
 0x10d   :  { %12 = sbr.rel (!%p10_p5) target bundleno = 2 (0x2), region = 69 }

</bundles_post_ra>
